<compile_context>
chip_gen: v5e
topology: v5e:2x2
jax: 0.10.0
libtpu: 0.0.40
codegen_flags: <defaults>
</compile_context>

<pallas_src>
import functools

import numpy as np
import jax
import jax.numpy as jnp
from jax import lax
from jax.experimental import pallas as pl
from jax.experimental.pallas import tpu as pltpu


EXPANSION = 4
EPS = 1e-5
_DEFAULT_ROW_TILE = 512   # pointwise row tile (multiple of 16 for bf16 packing)


def _round_up(x, m):
    return (x + m - 1) // m * m


def _mxu_group_target():
    """Minimum (super-)group width for MXU-friendly grouped matmuls:
    128 on 128x128-MXU parts (<= v5), 256 on 256-wide MXUs (v6e / v7x)."""
    try:
        kind = jax.devices()[0].device_kind.lower()
    except Exception:
        return 256
    for old in ("v2", "v3", "v4", "v5"):
        if old in kind:
            return 128
    return 256


def _plan_groups(bc, cardinality, target):
    """Pack `cardinality` groups of width cg into block-diagonal super-groups.

    Returns (n_super, sgw, groups_per_super) with sgw = cg * groups_per_super.
    """
    cg = bc // cardinality
    if cg >= target:
        return cardinality, cg, 1          # true grouped path, already wide
    p = cardinality                        # fallback: densify fully
    for d in range(1, cardinality + 1):
        if cardinality % d == 0 and cg * d >= target:
            p = d
            break
    return cardinality // p, cg * p, p


# --------------------------------------------------------------------------- #
# Pallas kernels
# --------------------------------------------------------------------------- #
def _pw_kernel(x_ref, w_ref, s_ref, b_ref, o_ref, *, apply_relu):
    """out = (x @ w) * scale + bias (+relu).  x:(TM,Cin) bf16, w:(Cin,Cout) bf16."""
    y = jnp.dot(x_ref[...], w_ref[...], preferred_element_type=jnp.float32)
    y = y * s_ref[...] + b_ref[...]
    if apply_relu:
        y = jnp.maximum(y, 0.0)
    o_ref[...] = y.astype(o_ref.dtype)


def _deconv_fused_kernel(x_ref, res_ref, w2_ref, s2_ref, b2_ref, w3_ref,
                         s3_ref, b3_ref, bsc_ref, o_ref, *,
                         H, W, phase_taps, n_super):
    """One (sample, output-phase) step of: grouped 3x3 stride-s deconv + BN +
    relu + 1x1 conv + BN + shortcut add + relu (phase decomposition).

    x_ref   : (1, Hp, Wp, bc)        padded stage-1 activation (bf16)
    res_ref : (1, H*W, Cout)         phase-(0,0) residual (bf16)
    w2_ref  : (9, n_super, sgw, sgw) block-diag super-grouped taps (bf16)
    w3_ref  : (bc, Cout)             final 1x1 weight (bf16)
    bsc_ref : (1, Cout)              shortcut BN bias for phases != (0,0)
    o_ref   : (1, 1, H*W, Cout)
    """
    bc = x_ref.shape[-1]
    hw = H * W
    sgw = bc // n_super
    phase = pl.program_id(1)

    s2 = s2_ref[...]
    b2 = b2_ref[...]
    s3 = s3_ref[...]
    b3 = b3_ref[...]

    def emit_phase(pidx, taps):
        y3 = None
        for g in range(n_super):
            lo = g * sgw
            # ---- stage 2: deconv taps for this phase / (super)group --------
            acc = None
            for (t, oh, ow) in taps:
                # bf16 shifted window of the padded stage-1 activation
                xw = x_ref[0, oh:oh + H, ow:ow + W, lo:lo + sgw].reshape(hw, sgw)
                d = jnp.dot(xw, w2_ref[t, g], preferred_element_type=jnp.float32)
                acc = d if acc is None else acc + d
            # ---- stage 2 BN + relu, stage 3 folded into the group loop -----
            z = jnp.maximum(acc * s2[:, lo:lo + sgw] + b2[:, lo:lo + sgw], 0.0)
            c = jnp.dot(z.astype(w3_ref.dtype), w3_ref[lo:lo + sgw, :],
                        preferred_element_type=jnp.float32)
            y3 = c if y3 is None else y3 + c
        # ---- stage 3 BN + residual + relu -----------------------------------
        y3 = y3 * s3 + b3
        if pidx == 0:
            y3 = y3 + res_ref[0].astype(jnp.float32)   # shortcut values on (0,0)
        else:
            y3 = y3 + bsc_ref[...]                     # elsewhere only BN bias
        o_ref[0, 0] = jnp.maximum(y3, 0.0).astype(o_ref.dtype)

    for pidx, taps in enumerate(phase_taps):
        pl.when(phase == pidx)(functools.partial(emit_phase, pidx, taps))


# --------------------------------------------------------------------------- #
# pallas_call wrappers
# --------------------------------------------------------------------------- #
def pointwise_conv_bn(x2d, w, scale, bias, *, relu, out_dtype,
                      tm=_DEFAULT_ROW_TILE):
    """Row-tiled fused 1x1 conv + BN (+relu): out[M,Cout] = act((x @ w)*s + b)."""
    M, Cin = x2d.shape
    Cout = w.shape[1]
    tm = min(tm, _round_up(M, 16))
    Mp = _round_up(M, tm)
    if Mp != M:
        x2d = jnp.pad(x2d, ((0, Mp - M), (0, 0)))

    def isz(a):
        return jnp.dtype(a.dtype).itemsize

    cost = pl.CostEstimate(
        flops=int(2 * Mp * Cin * Cout), transcendentals=0,
        bytes_accessed=int(Mp * Cin * isz(x2d) + Cin * Cout * isz(w)
                           + Mp * Cout * jnp.dtype(out_dtype).itemsize))
    out = pl.pallas_call(
        functools.partial(_pw_kernel, apply_relu=relu),
        out_shape=jax.ShapeDtypeStruct((Mp, Cout), out_dtype),
        grid=(Mp // tm,),
        in_specs=[pl.BlockSpec((tm, Cin), lambda i: (i, 0)),
                  pl.BlockSpec((Cin, Cout), lambda i: (0, 0)),
                  pl.BlockSpec((1, Cout), lambda i: (0, 0)),
                  pl.BlockSpec((1, Cout), lambda i: (0, 0))],
        out_specs=pl.BlockSpec((tm, Cout), lambda i: (i, 0)),
        compiler_params=pltpu.CompilerParams(
            dimension_semantics=("parallel",)),
        cost_estimate=cost,
    )(x2d, w, scale, bias)
    return out[:M] if Mp != M else out


def deconv_conv_fused(y1p, res, w2, s2, b2, w3, s3, b3, bsc, *,
                      stride, phase_taps, H, W, n_super, out_dtype):
    N, Hp, Wp, bc = y1p.shape
    Cout = w3.shape[1]
    HW = H * W
    ss = stride * stride
    sgw = bc // n_super
    ntaps = sum(len(t) for t in phase_taps)

    # --- explicit VMEM budget: double-buffered pipeline blocks + temporaries
    blk_bytes = (Hp * Wp * bc * jnp.dtype(y1p.dtype).itemsize
                 + HW * Cout * jnp.dtype(res.dtype).itemsize
                 + int(np.prod(w2.shape)) * jnp.dtype(w2.dtype).itemsize
                 + bc * Cout * jnp.dtype(w3.dtype).itemsize
                 + (2 * bc + 3 * Cout) * 4)
    out_bytes = HW * Cout * jnp.dtype(out_dtype).itemsize
    tmp_bytes = (HW * sgw * 2          # live bf16 window
                 + 2 * HW * sgw * 4    # acc + z (f32)
                 + 2 * HW * Cout * 4)  # y3 accumulation + epilogue temps
    vmem_limit = int(min(max((2 * (blk_bytes + out_bytes) + tmp_bytes) * 5 // 4,
                             32 << 20), 128 << 20))

    cost = pl.CostEstimate(
        flops=int(2 * N * ss * HW * bc * Cout + 2 * N * HW * ntaps * bc * sgw),
        transcendentals=0,
        bytes_accessed=int(y1p.size * jnp.dtype(y1p.dtype).itemsize
                           + res.size * jnp.dtype(res.dtype).itemsize
                           + w2.size * jnp.dtype(w2.dtype).itemsize
                           + w3.size * jnp.dtype(w3.dtype).itemsize
                           + N * ss * HW * Cout * jnp.dtype(out_dtype).itemsize))

    kernel = functools.partial(_deconv_fused_kernel, H=H, W=W,
                               phase_taps=phase_taps, n_super=n_super)
    return pl.pallas_call(
        kernel,
        out_shape=jax.ShapeDtypeStruct((N, ss, HW, Cout), out_dtype),
        grid=(N, ss),
        in_specs=[pl.BlockSpec((1, Hp, Wp, bc), lambda n, p: (n, 0, 0, 0)),
                  pl.BlockSpec((1, HW, Cout), lambda n, p: (n, 0, 0)),
                  pl.BlockSpec((9, n_super, sgw, sgw), lambda n, p: (0, 0, 0, 0)),
                  pl.BlockSpec((1, bc), lambda n, p: (0, 0)),
                  pl.BlockSpec((1, bc), lambda n, p: (0, 0)),
                  pl.BlockSpec((bc, Cout), lambda n, p: (0, 0)),
                  pl.BlockSpec((1, Cout), lambda n, p: (0, 0)),
                  pl.BlockSpec((1, Cout), lambda n, p: (0, 0)),
                  pl.BlockSpec((1, Cout), lambda n, p: (0, 0))],
        out_specs=pl.BlockSpec((1, 1, HW, Cout), lambda n, p: (n, p, 0, 0)),
        compiler_params=pltpu.CompilerParams(
            dimension_semantics=("parallel", "parallel"),
            vmem_limit_bytes=vmem_limit),
        cost_estimate=cost,
    )(y1p, res, w2, s2, b2, w3, s3, b3, bsc)


# --------------------------------------------------------------------------- #
# Sub-pixel (phase) decomposition of ConvTranspose2d(k=3, p=1, op=stride-1)
# --------------------------------------------------------------------------- #
def _phase_tap_structure(stride):
    """phases[rh*stride+rw] = list of (tap_index kh*3+kw into the FLIPPED 3x3
    kernel, row_offset, col_offset) into the stage-1 activation padded by
    pad_lo (top/left) and pad_hi (bottom/right)."""
    def taps_1d(r):
        out = []
        for k in range(3):
            t = r + k - 1
            if t % stride == 0:
                out.append((k, t // stride))
        return out

    per_r = [taps_1d(r) for r in range(stride)]
    d_all = [d for lst in per_r for (_, d) in lst]
    pad_lo = max(0, -min(d_all))
    pad_hi = max(0, max(d_all))
    phases = []
    for rh in range(stride):
        for rw in range(stride):
            phases.append([(kh * 3 + kw, dh + pad_lo, dw + pad_lo)
                           for (kh, dh) in per_r[rh] for (kw, dw) in per_r[rw]])
    return phases, pad_lo, pad_hi


# --------------------------------------------------------------------------- #
# Parameter init (matches the PyTorch module's parameter shapes)
# --------------------------------------------------------------------------- #
def init_params(key, in_channels, out_channels, stride, cardinality):
    bc = cardinality * out_channels // EXPANSION
    ks = jax.random.split(key, 8)

    def w(k, shape):
        return jax.random.normal(k, shape, jnp.float32) * 0.1

    def bn(k, c):
        k1, k2, k3, k4 = jax.random.split(k, 4)
        gamma = jax.random.uniform(k1, (c,), jnp.float32, 0.5, 1.5)
        beta = jax.random.normal(k2, (c,), jnp.float32) * 0.1
        mean = jax.random.normal(k3, (c,), jnp.float32) * 0.1
        var = jax.random.uniform(k4, (c,), jnp.float32, 0.5, 1.5)
        return gamma, beta, mean, var

    params = dict(
        w1=w(ks[0], (bc, in_channels, 1, 1)),                 # Conv2d OIHW
        bn1=bn(ks[1], bc),
        w2=w(ks[2], (bc, bc // cardinality, 3, 3)),           # ConvTranspose2d (in, out//g, kh, kw)
        bn2=bn(ks[3], bc),
        w3=w(ks[4], (out_channels, bc, 1, 1)),                # Conv2d OIHW
        bn3=bn(ks[5], out_channels),
    )
    if in_channels != out_channels:
        params["ws"] = w(ks[6], (in_channels, out_channels, 1, 1))   # ConvTranspose2d
        params["bns"] = bn(ks[7], out_channels)
    return params


def _fold_bn(bn):
    gamma, beta, mean, var = bn
    scale = gamma / jnp.sqrt(var + EPS)
    bias = beta - mean * scale
    return scale.reshape(1, -1), bias.reshape(1, -1)


# --------------------------------------------------------------------------- #
# Forward pass (Pallas path)
# --------------------------------------------------------------------------- #
def deconv_bottleneck_forward(params, x_nchw, *, stride, cardinality,
                              in_channels, out_channels):
    N, Cin, H, W = x_nchw.shape
    assert Cin == in_channels
    s = stride
    bc = cardinality * out_channels // EXPANSION
    cg = bc // cardinality
    Ho, Wo = H * s, W * s

    # TODO(synk): the NCHW->NHWC input transpose could be fused into the
    # stage-1 kernel (in-kernel XLU transpose); kept as one wrapper pass here.
    x = jnp.transpose(x_nchw, (0, 2, 3, 1))                   # NHWC f32
    x2d_bf = x.reshape(N * H * W, Cin).astype(jnp.bfloat16)

    # ---- stage 1: 1x1 conv + BN + relu (row-tiled matmul kernel, bf16 out) --
    w1m = params["w1"][:, :, 0, 0].T.astype(jnp.bfloat16)     # (Cin, bc)
    s1, b1 = _fold_bn(params["bn1"])
    y1 = pointwise_conv_bn(x2d_bf, w1m, s1, b1, relu=True,
                           out_dtype=jnp.bfloat16).reshape(N, H, W, bc)

    # ---- stage 2 setup: phase taps + flipped, super-grouped weights ---------
    phase_taps, pad_lo, pad_hi = _phase_tap_structure(s)
    y1p = jnp.pad(y1, ((0, 0), (pad_lo, pad_hi), (pad_lo, pad_hi), (0, 0)))

    wt2f = params["w2"][:, :, ::-1, ::-1]                     # (bc, cg, 3, 3) flipped
    w2g = jnp.transpose(wt2f.reshape(cardinality, cg, cg, 3, 3),
                        (3, 4, 0, 1, 2)).reshape(9, cardinality, cg, cg)
    n_super, sgw, gper = _plan_groups(bc, cardinality, _mxu_group_target())
    if gper == 1:
        w2k = w2g                                             # already MXU-wide groups
    else:
        # Pack `gper` groups per block-diagonal super-group of width sgw.
        w2k = jnp.zeros((9, n_super, sgw, sgw), wt2f.dtype)
        for sgi in range(n_super):
            for j in range(gper):
                g = sgi * gper + j
                w2k = w2k.at[:, sgi, j * cg:(j + 1) * cg,
                             j * cg:(j + 1) * cg].set(w2g[:, g])
    w2k = w2k.astype(jnp.bfloat16)
    s2, b2 = _fold_bn(params["bn2"])

    # ---- shortcut (fused into the phase kernel as the (0,0) residual) -------
    if in_channels != out_channels:
        wsm = params["ws"][:, :, 0, 0].astype(jnp.bfloat16)   # (Cin, Cout)
        ss_, bs_ = _fold_bn(params["bns"])
        res = pointwise_conv_bn(x2d_bf, wsm, ss_, bs_, relu=False,
                                out_dtype=jnp.bfloat16)
        res = res.reshape(N, H * W, out_channels)
        bsc = bs_                                             # (1, Cout)
    else:
        assert s == 1, "identity shortcut requires stride == 1"
        res = x.reshape(N, H * W, out_channels).astype(jnp.bfloat16)
        bsc = jnp.zeros((1, out_channels), jnp.float32)

    # ---- stages 2 + 3 fused (deconv + BN + relu + 1x1 + BN + add + relu) ----
    w3m = params["w3"][:, :, 0, 0].T.astype(jnp.bfloat16)     # (bc, Cout)
    s3, b3 = _fold_bn(params["bn3"])
    yph = deconv_conv_fused(y1p, res, w2k, s2, b2, w3m, s3, b3, bsc,
                            stride=s, phase_taps=phase_taps, H=H, W=W,
                            n_super=n_super,
                            out_dtype=jnp.float32)            # (N, s*s, H*W, Cout)

    # phase layout -> NCHW in a single composed transpose (one HBM pass)
    y = yph.reshape(N, s, s, H, W, out_channels)
    y = jnp.transpose(y, (0, 5, 3, 1, 4, 2)).reshape(N, out_channels, Ho, Wo)
    return y


# --------------------------------------------------------------------------- #
# Pure-JAX reference (direct ConvTranspose2d definition) for validation
# --------------------------------------------------------------------------- #
def _conv_transpose2d_ref(x, w, stride, padding, output_padding, groups):
    N, Cin, H, W = x.shape
    _, Cog, kH, kW = w.shape
    Cout = Cog * groups
    Ho = (H - 1) * stride - 2 * padding + kH + output_padding
    Wo = (W - 1) * stride - 2 * padding + kW + output_padding
    buf = jnp.zeros((N, Cout, Ho + 2 * padding, Wo + 2 * padding), x.dtype)
    cig = Cin // groups
    for g in range(groups):
        xg = x[:, g * cig:(g + 1) * cig]
        wg = w[g * cig:(g + 1) * cig]
        for kh in range(kH):
            for kw in range(kW):
                contrib = jnp.einsum('nchw,cd->ndhw', xg, wg[:, :, kh, kw])
                buf = buf.at[:, g * Cog:(g + 1) * Cog,
                             kh:kh + (H - 1) * stride + 1:stride,
                             kw:kw + (W - 1) * stride + 1:stride].add(contrib)
    return buf[:, :, padding:padding + Ho, padding:padding + Wo]


def reference_forward(params, x, *, stride, cardinality, in_channels, out_channels):
    def bn_apply(t, bn):
        gamma, beta, mean, var = bn
        sc = gamma / jnp.sqrt(var + EPS)
        return t * sc[None, :, None, None] + (beta - mean * sc)[None, :, None, None]

    dn = ('NCHW', 'OIHW', 'NCHW')
    y = lax.conv_general_dilated(x, params['w1'], (1, 1), 'VALID', dimension_numbers=dn)
    y = jax.nn.relu(bn_apply(y, params['bn1']))
    y = _conv_transpose2d_ref(y, params['w2'], stride, 1, stride - 1, cardinality)
    y = jax.nn.relu(bn_apply(y, params['bn2']))
    y = lax.conv_general_dilated(y, params['w3'], (1, 1), 'VALID', dimension_numbers=dn)
    y = bn_apply(y, params['bn3'])
    if in_channels != out_channels:
        sc = _conv_transpose2d_ref(x, params['ws'], stride, 0, stride - 1, 1)
        sc = bn_apply(sc, params['bns'])
    else:
        sc = x
    return jax.nn.relu(y + sc)


# --------------------------------------------------------------------------- #
if __name__ == "__main__":
    test_configs = [
        # (in_channels, out_channels, stride, cardinality, N, H, W)
        (16, 32, 2, 4, 2, 16, 16),    # small groups -> block-diag densified
        (128, 512, 2, 2, 1, 4, 4),    # wide groups -> super-grouped MXU path
        (32, 32, 1, 4, 1, 8, 8),      # identity shortcut, stride 1
    ]
    key = jax.random.PRNGKey(0)
    for (ic, oc, st, card, N, H, W) in test_configs:
        key, kp, kx = jax.random.split(key, 3)
        params = init_params(kp, ic, oc, st, card)
        x = jax.random.normal(kx, (N, ic, H, W), jnp.float32)

        out = deconv_bottleneck_forward(params, x, stride=st, cardinality=card,
                                        in_channels=ic, out_channels=oc)
        out = jax.block_until_ready(out)

        ref = reference_forward(params, x, stride=st, cardinality=card,
                                in_channels=ic, out_channels=oc)
        np.testing.assert_allclose(np.asarray(out), np.asarray(ref),
                                   atol=5e-2, rtol=5e-2)

    print("KERNEL_OK")
</pallas_src>

<mosaic_0001>
module attributes {stable_mosaic.version = 11 : i64} {
  func.func @_pw_kernel(%arg0: i32, %arg1: memref<512x16xbf16, #tpu.memory_space<vmem>>, %arg2: memref<16x32xbf16, #tpu.memory_space<vmem>>, %arg3: memref<1x32xf32, #tpu.memory_space<vmem>>, %arg4: memref<1x32xf32, #tpu.memory_space<vmem>>, %arg5: memref<512x32xbf16, #tpu.memory_space<vmem>>) attributes {dimension_semantics = [#tpu.dimension_semantics<parallel>], iteration_bounds = array<i64: 1>, scalar_prefetch = 0 : i64, scratch_operands = 0 : i64, tpu.core_type = #tpu.core_type<tc>, window_params = [{transform_indices = @transform_0, window_bounds = array<i64: 512, 16>}, {pipeline_mode = #tpu.pipeline_mode<synchronous>, transform_indices = @transform_1, window_bounds = array<i64: 16, 32>}, {pipeline_mode = #tpu.pipeline_mode<synchronous>, transform_indices = @transform_2, window_bounds = array<i64: 1, 32>}, {pipeline_mode = #tpu.pipeline_mode<synchronous>, transform_indices = @transform_3, window_bounds = array<i64: 1, 32>}, {transform_indices = @transform_4, window_bounds = array<i64: 512, 32>}]} {
    %c0 = arith.constant 0 : index
    %c0_0 = arith.constant 0 : index
    %0 = vector.load %arg1[%c0, %c0_0] : memref<512x16xbf16, #tpu.memory_space<vmem>>, vector<512x16xbf16>
    %c0_1 = arith.constant 0 : index
    %c0_2 = arith.constant 0 : index
    %1 = vector.load %arg2[%c0_1, %c0_2] : memref<16x32xbf16, #tpu.memory_space<vmem>>, vector<16x32xbf16>
    %cst = arith.constant dense<0.000000e+00> : vector<512x32xf32>
    %2 = tpu.matmul %0, %1, %cst {dimension_numbers = #tpu.dot_dimension_numbers<[1], [0], [0], [1], [0, 0, 1, 1], [], []>} : vector<512x16xbf16>, vector<16x32xbf16>, vector<512x32xf32> -> vector<512x32xf32>
    %c0_3 = arith.constant 0 : index
    %c0_4 = arith.constant 0 : index
    %3 = vector.load %arg3[%c0_3, %c0_4] : memref<1x32xf32, #tpu.memory_space<vmem>>, vector<1x32xf32>
    %4 = vector.broadcast %3 : vector<1x32xf32> to vector<512x32xf32>
    %5 = arith.mulf %2, %4 : vector<512x32xf32>
    %c0_5 = arith.constant 0 : index
    %c0_6 = arith.constant 0 : index
    %6 = vector.load %arg4[%c0_5, %c0_6] : memref<1x32xf32, #tpu.memory_space<vmem>>, vector<1x32xf32>
    %7 = vector.broadcast %6 : vector<1x32xf32> to vector<512x32xf32>
    %8 = arith.addf %5, %7 : vector<512x32xf32>
    %cst_7 = arith.constant 0.000000e+00 : f32
    %9 = vector.broadcast %cst_7 : f32 to vector<512x32xf32>
    %10 = arith.maximumf %8, %9 : vector<512x32xf32>
    %11 = arith.truncf %10 : vector<512x32xf32> to vector<512x32xbf16>
    %c0_8 = arith.constant 0 : index
    %c0_9 = arith.constant 0 : index
    %12 = vector.load %arg5[%c0_8, %c0_9] : memref<512x32xbf16, #tpu.memory_space<vmem>>, vector<512x32xbf16>
    tpu.vector_store %arg5[%c0_8, %c0_9], %11 {strides = array<i32>} : memref<512x32xbf16, #tpu.memory_space<vmem>>, vector<512x32xbf16>,
    return
  }
  func.func @transform_0(%arg0: i32) -> (i32, i32) {
    %c0_i32 = arith.constant 0 : i32
    %c0_i32_0 = arith.constant 0 : i32
    return %arg0, %c0_i32 : i32, i32
  }
  func.func @transform_1(%arg0: i32) -> (i32, i32) {
    %c0_i32 = arith.constant 0 : i32
    %c0_i32_0 = arith.constant 0 : i32
    %c0_i32_1 = arith.constant 0 : i32
    return %c0_i32, %c0_i32_0 : i32, i32
  }
  func.func @transform_2(%arg0: i32) -> (i32, i32) {
    %c0_i32 = arith.constant 0 : i32
    %c0_i32_0 = arith.constant 0 : i32
    %c0_i32_1 = arith.constant 0 : i32
    return %c0_i32, %c0_i32_0 : i32, i32
  }
  func.func @transform_3(%arg0: i32) -> (i32, i32) {
    %c0_i32 = arith.constant 0 : i32
    %c0_i32_0 = arith.constant 0 : i32
    %c0_i32_1 = arith.constant 0 : i32
    return %c0_i32, %c0_i32_0 : i32, i32
  }
  func.func @transform_4(%arg0: i32) -> (i32, i32) {
    %c0_i32 = arith.constant 0 : i32
    %c0_i32_0 = arith.constant 0 : i32
    return %arg0, %c0_i32 : i32, i32
  }
}

</mosaic_0001>

<bundles_post_ra>
// kernel: tpu_custom_call.1
= control target key start
LH: loop header
LB: loop body
LE: loop exit
PB: predicated region body
PF: predicated region fallthrough
CT: control target
= control target key end

     0   :  { %vm250_vm0 = vcmask 130048   ;;  %vm780_vm1 = vcmask 257024   ;;  %s1601_s1 = inlined_call_operand.vmem [shape: bf16[16,32], index: 1, kind: input, shape index: {}]   ;;  %s1602_s0 = inlined_call_operand.vmem [shape: bf16[512,16], index: 0, kind: input, shape index: {}]   ;;  %s1603_s2 = inlined_call_operand.vmem [shape: f32[1,32], index: 2, kind: input, shape index: {}]   ;;  %s1604_s3 = inlined_call_operand.vmem [shape: f32[1,32], index: 3, kind: input, shape index: {}]   ;;  %s1605_s4 = inlined_call_operand.vmem [shape: bf16[512,32], index: 4, kind: output, shape index: {}]  }
   0x1   :  { %v1045_v0 = vld [vmem:[%s1601_s1] sm:$0xff]  ;;  %v1014_v5 = vld [vmem:[%s1602_s0 + $0x8] sm:$0xff]  ;;  %v1015_v9 = vld [vmem:[%s1602_s0 + $0x10] sm:$0xff] }
   0x2   :  { %v1013_v1 = vld [vmem:[%s1602_s0] sm:$0xff]  ;;  %354 = vmatpush.bf16.msra.mxu0 %v1045_v0  ;;  %1046 = vmatpush.bf16.msra.mxu1 %v1045_v0  ;;  %v1022_v6 = vld [vmem:[%s1602_s0 + $0x48] sm:$0xff]  ;;  %v1023_v10 = vld [vmem:[%s1602_s0 + $0x50] sm:$0xff] }
   0x3   :  { %v1021_v2 = vld [vmem:[%s1602_s0 + $0x40] sm:$0xff]  ;;  %1047 = vmatpush.bf16.msra.mxu2 %v1045_v0  ;;  %1048 = vmatpush.bf16.msra.mxu3 %v1045_v0  ;;  %v1030_v7 = vld [vmem:[%s1602_s0 + $0x88] sm:$0xff]  ;;  %v1031_v11 = vld [vmem:[%s1602_s0 + $0x90] sm:$0xff] }
   0x4   :  { %v1029_v3 = vld [vmem:[%s1602_s0 + $0x80] sm:$0xff]  ;;  %v1038_v8 = vld [vmem:[%s1602_s0 + $0xc8] sm:$0xff]  ;;  %v1039_v12 = vld [vmem:[%s1602_s0 + $0xd0] sm:$0xff] }
   0x5   :  { %v1037_v4 = vld [vmem:[%s1602_s0 + $0xc0] sm:$0xff]  ;;  %981 = vmatmul.msk.bf16.vlgmr.msra.gmra.mxu0 %vm250_vm0, %v1013_v1  ;;  %989 = vmatmul.msk.bf16.vlgmr.msra.gmra.mxu1 %vm250_vm0, %v1021_v2  ;;  %v1016_v13 = vld [vmem:[%s1602_s0 + $0x18] sm:$0xff]  ;;  %v1018_v21 = vld [vmem:[%s1602_s0 + $0x28] sm:$0xff] }
   0x6   :  { %997 = vmatmul.msk.bf16.vlgmr.msra.gmra.mxu2 %vm250_vm0, %v1029_v3  ;;  %1005 = vmatmul.msk.bf16.vlgmr.msra.gmra.mxu3 %vm250_vm0, %v1037_v4  ;;  %v1024_v14 = vld [vmem:[%s1602_s0 + $0x58] sm:$0xff]  ;;  %v1017_v17 = vld [vmem:[%s1602_s0 + $0x20] sm:$0xff]  ;;  %v1026_v22 = vld [vmem:[%s1602_s0 + $0x68] sm:$0xff] }
   0x7   :  { %v1032_v15 = vld [vmem:[%s1602_s0 + $0x98] sm:$0xff]  ;;  %v1025_v18 = vld [vmem:[%s1602_s0 + $0x60] sm:$0xff]  ;;  %v1034_v23 = vld [vmem:[%s1602_s0 + $0xa8] sm:$0xff] }
   0x8   :  { %v1040_v16 = vld [vmem:[%s1602_s0 + $0xd8] sm:$0xff]  ;;  %v1033_v19 = vld [vmem:[%s1602_s0 + $0xa0] sm:$0xff]  ;;  %v1042_v24 = vld [vmem:[%s1602_s0 + $0xe8] sm:$0xff] }
   0x9   :  { %v1041_v20 = vld [vmem:[%s1602_s0 + $0xe0] sm:$0xff]  ;;  %v1019_v25 = vld [vmem:[%s1602_s0 + $0x30] sm:$0xff]  ;;  %v1020_v29 = vld [vmem:[%s1602_s0 + $0x38] sm:$0xff] }
   0xa   :  { %v1027_v26 = vld [vmem:[%s1602_s0 + $0x70] sm:$0xff]  ;;  %v1028_v30 = vld [vmem:[%s1602_s0 + $0x78] sm:$0xff]  ;;  %v1210_v33 = vld [vmem:[%s1603_s2] ss:$0 sm:$0xff] }
   0xb   :  { %v1035_v27 = vld [vmem:[%s1602_s0 + $0xb0] sm:$0xff]  ;;  %v1036_v31 = vld [vmem:[%s1602_s0 + $0xb8] sm:$0xff]  ;;  %v1215_v34 = vld [vmem:[%s1604_s3] ss:$0 sm:$0xff] }
   0xc   :  { %v1043_v28 = vld [vmem:[%s1602_s0 + $0xf0] sm:$0xff]  ;;  %v1044_v32 = vld [vmem:[%s1602_s0 + $0xf8] sm:$0xff] }
  0x15   :  { %982 = vmatmul.msk.bf16.gmra.mxu0 %vm250_vm0, %v1014_v5  ;;  %990 = vmatmul.msk.bf16.gmra.mxu1 %vm250_vm0, %v1022_v6 }
  0x16   :  { %998 = vmatmul.msk.bf16.gmra.mxu2 %vm250_vm0, %v1030_v7  ;;  %1006 = vmatmul.msk.bf16.gmra.mxu3 %vm250_vm0, %v1038_v8 }
  0x25   :  { %983 = vmatmul.msk.bf16.gmra.mxu0 %vm250_vm0, %v1015_v9  ;;  %991 = vmatmul.msk.bf16.gmra.mxu1 %vm250_vm0, %v1023_v10 }
  0x26   :  { %999 = vmatmul.msk.bf16.gmra.mxu2 %vm250_vm0, %v1031_v11  ;;  %1007 = vmatmul.msk.bf16.gmra.mxu3 %vm250_vm0, %v1039_v12 }
  0x35   :  { %984 = vmatmul.msk.bf16.gmra.mxu0 %vm250_vm0, %v1016_v13  ;;  %992 = vmatmul.msk.bf16.gmra.mxu1 %vm250_vm0, %v1024_v14 }
  0x36   :  { %1000 = vmatmul.msk.bf16.gmra.mxu2 %vm250_vm0, %v1032_v15  ;;  %1008 = vmatmul.msk.bf16.gmra.mxu3 %vm250_vm0, %v1040_v16 }
  0x45   :  { %985 = vmatmul.msk.bf16.gmra.mxu0 %vm250_vm0, %v1017_v17  ;;  %993 = vmatmul.msk.bf16.gmra.mxu1 %vm250_vm0, %v1025_v18 }
  0x46   :  { %1001 = vmatmul.msk.bf16.gmra.mxu2 %vm250_vm0, %v1033_v19  ;;  %1009 = vmatmul.msk.bf16.gmra.mxu3 %vm250_vm0, %v1041_v20 }
  0x55   :  { %986 = vmatmul.msk.bf16.gmra.mxu0 %vm250_vm0, %v1018_v21  ;;  %994 = vmatmul.msk.bf16.gmra.mxu1 %vm250_vm0, %v1026_v22 }
  0x56   :  { %1002 = vmatmul.msk.bf16.gmra.mxu2 %vm250_vm0, %v1034_v23  ;;  %1010 = vmatmul.msk.bf16.gmra.mxu3 %vm250_vm0, %v1042_v24 }
  0x65   :  { %987 = vmatmul.msk.bf16.gmra.mxu0 %vm250_vm0, %v1019_v25  ;;  %995 = vmatmul.msk.bf16.gmra.mxu1 %vm250_vm0, %v1027_v26 }
  0x66   :  { %1003 = vmatmul.msk.bf16.gmra.mxu2 %vm250_vm0, %v1035_v27  ;;  %1011 = vmatmul.msk.bf16.gmra.mxu3 %vm250_vm0, %v1043_v28 }
  0x75   :  { %988 = vmatmul.msk.bf16.gmra.mxu0 %vm250_vm0, %v1020_v29  ;;  %996 = vmatmul.msk.bf16.gmra.mxu1 %vm250_vm0, %v1028_v30 }
  0x76   :  { %1004 = vmatmul.msk.bf16.gmra.mxu2 %vm250_vm0, %v1036_v31  ;;  %1012 = vmatmul.msk.bf16.gmra.mxu3 %vm250_vm0, %v1044_v32 }
  0x82   :  { %v356_v35 = vpop.f32.mrf.mxu0  ;;  %v396_v36 = vpop.f32.mrf.mxu1 }
  0x83   :  { %v520_v37 = vmul.f32 %v1210_v33, %v356_v35  ;;  %v536_v38 = vmul.f32 %v1210_v33, %v396_v36 }
  0x85   :  { %v588_v39 = vadd.f32 %v1215_v34, %v520_v37  ;;  %v604_v40 = vadd.f32 %v1215_v34, %v536_v38 }
  0x87   :  { %v652_v41 = vmax.f32 %v588_v39, 0.0  ;;  %v668_v42 = vmax.f32 %v604_v40, 0.0 }
  0x89   :  { %v716_v43 = vpack.c.bf16 %v652_v41, %v652_v41  ;;  %v732_v44 = vpack.c.bf16 %v668_v42, %v668_v42  ;;  %v436_v45 = vpop.f32.mrf.mxu2  ;;  %v476_v46 = vpop.f32.mrf.mxu3 }
  0x8a   :  { %v552_v47 = vmul.f32 %v1210_v33, %v436_v45  ;;  %v568_v48 = vmul.f32 %v1210_v33, %v476_v46  ;;  %v358_v49 = vpop.f32.mrf.mxu0  ;;  %v398_v50 = vpop.f32.mrf.mxu1 }
  0x8b   :  { %781 = vst.msk [vmem:[%s1605_s4] sm:$0xf] %vm780_vm1, %v716_v43  ;;  %v521_v51 = vmul.f32 %v1210_v33, %v358_v49  ;;  %v537_v52 = vmul.f32 %v1210_v33, %v398_v50 }
  0x8c   :  { %797 = vst.msk [vmem:[%s1605_s4 + $0x40] sm:$0xf] %vm780_vm1, %v732_v44  ;;  %v620_v53 = vadd.f32 %v1215_v34, %v552_v47  ;;  %v636_v54 = vadd.f32 %v1215_v34, %v568_v48 }
  0x8d   :  { %v589_v55 = vadd.f32 %v1215_v34, %v521_v51  ;;  %v605_v56 = vadd.f32 %v1215_v34, %v537_v52 }
  0x8e   :  { %v684_v57 = vmax.f32 %v620_v53, 0.0  ;;  %v700_v58 = vmax.f32 %v636_v54, 0.0 }
  0x8f   :  { %v653_v59 = vmax.f32 %v589_v55, 0.0  ;;  %v669_v60 = vmax.f32 %v605_v56, 0.0 }
  0x90   :  { %v748_v61 = vpack.c.bf16 %v684_v57, %v684_v57  ;;  %v764_v62 = vpack.c.bf16 %v700_v58, %v700_v58 }
  0x91   :  { %v717_v63 = vpack.c.bf16 %v653_v59, %v653_v59  ;;  %v733_v0 = vpack.c.bf16 %v669_v60, %v669_v60  ;;  %v438_v1 = vpop.f32.mrf.mxu2  ;;  %v478_v2 = vpop.f32.mrf.mxu3 }
  0x92   :  { %813 = vst.msk [vmem:[%s1605_s4 + $0x80] sm:$0xf] %vm780_vm1, %v748_v61  ;;  %v553_v3 = vmul.f32 %v1210_v33, %v438_v1  ;;  %v569_v4 = vmul.f32 %v1210_v33, %v478_v2  ;;  %v361_v5 = vpop.f32.mrf.mxu0  ;;  %v401_v6 = vpop.f32.mrf.mxu1 }
  0x93   :  { %829 = vst.msk [vmem:[%s1605_s4 + $0xc0] sm:$0xf] %vm780_vm1, %v764_v62  ;;  %v522_v7 = vmul.f32 %v1210_v33, %v361_v5  ;;  %v538_v8 = vmul.f32 %v1210_v33, %v401_v6 }
  0x94   :  { %782 = vst.msk [vmem:[%s1605_s4 + $0x4] sm:$0xf] %vm780_vm1, %v717_v63  ;;  %v621_v9 = vadd.f32 %v1215_v34, %v553_v3  ;;  %v637_v10 = vadd.f32 %v1215_v34, %v569_v4 }
  0x95   :  { %798 = vst.msk [vmem:[%s1605_s4 + $0x44] sm:$0xf] %vm780_vm1, %v733_v0  ;;  %v590_v11 = vadd.f32 %v1215_v34, %v522_v7  ;;  %v606_v12 = vadd.f32 %v1215_v34, %v538_v8 }
  0x96   :  { %v685_v13 = vmax.f32 %v621_v9, 0.0  ;;  %v701_v14 = vmax.f32 %v637_v10, 0.0 }
  0x97   :  { %v654_v15 = vmax.f32 %v590_v11, 0.0  ;;  %v670_v16 = vmax.f32 %v606_v12, 0.0 }
  0x98   :  { %v749_v17 = vpack.c.bf16 %v685_v13, %v685_v13  ;;  %v765_v18 = vpack.c.bf16 %v701_v14, %v701_v14 }
  0x99   :  { %v718_v19 = vpack.c.bf16 %v654_v15, %v654_v15  ;;  %v734_v20 = vpack.c.bf16 %v670_v16, %v670_v16  ;;  %v441_v21 = vpop.f32.mrf.mxu2  ;;  %v481_v22 = vpop.f32.mrf.mxu3 }
  0x9a   :  { %814 = vst.msk [vmem:[%s1605_s4 + $0x84] sm:$0xf] %vm780_vm1, %v749_v17  ;;  %v554_v23 = vmul.f32 %v1210_v33, %v441_v21  ;;  %v570_v24 = vmul.f32 %v1210_v33, %v481_v22  ;;  %v363_v25 = vpop.f32.mrf.mxu0  ;;  %v403_v26 = vpop.f32.mrf.mxu1 }
  0x9b   :  { %830 = vst.msk [vmem:[%s1605_s4 + $0xc4] sm:$0xf] %vm780_vm1, %v765_v18  ;;  %v523_v27 = vmul.f32 %v1210_v33, %v363_v25  ;;  %v539_v28 = vmul.f32 %v1210_v33, %v403_v26 }
  0x9c   :  { %783 = vst.msk [vmem:[%s1605_s4 + $0x8] sm:$0xf] %vm780_vm1, %v718_v19  ;;  %v622_v29 = vadd.f32 %v1215_v34, %v554_v23  ;;  %v638_v30 = vadd.f32 %v1215_v34, %v570_v24 }
  0x9d   :  { %799 = vst.msk [vmem:[%s1605_s4 + $0x48] sm:$0xf] %vm780_vm1, %v734_v20  ;;  %v591_v31 = vadd.f32 %v1215_v34, %v523_v27  ;;  %v607_v32 = vadd.f32 %v1215_v34, %v539_v28 }
  0x9e   :  { %v686_v35 = vmax.f32 %v622_v29, 0.0  ;;  %v702_v36 = vmax.f32 %v638_v30, 0.0 }
  0x9f   :  { %v655_v37 = vmax.f32 %v591_v31, 0.0  ;;  %v671_v38 = vmax.f32 %v607_v32, 0.0 }
  0xa0   :  { %v750_v39 = vpack.c.bf16 %v686_v35, %v686_v35  ;;  %v766_v40 = vpack.c.bf16 %v702_v36, %v702_v36 }
  0xa1   :  { %v719_v41 = vpack.c.bf16 %v655_v37, %v655_v37  ;;  %v735_v42 = vpack.c.bf16 %v671_v38, %v671_v38  ;;  %v443_v43 = vpop.f32.mrf.mxu2  ;;  %v483_v44 = vpop.f32.mrf.mxu3 }
  0xa2   :  { %815 = vst.msk [vmem:[%s1605_s4 + $0x88] sm:$0xf] %vm780_vm1, %v750_v39  ;;  %v555_v45 = vmul.f32 %v1210_v33, %v443_v43  ;;  %v571_v46 = vmul.f32 %v1210_v33, %v483_v44  ;;  %v366_v47 = vpop.f32.mrf.mxu0  ;;  %v406_v48 = vpop.f32.mrf.mxu1 }
  0xa3   :  { %831 = vst.msk [vmem:[%s1605_s4 + $0xc8] sm:$0xf] %vm780_vm1, %v766_v40  ;;  %v524_v49 = vmul.f32 %v1210_v33, %v366_v47  ;;  %v540_v50 = vmul.f32 %v1210_v33, %v406_v48 }
  0xa4   :  { %784 = vst.msk [vmem:[%s1605_s4 + $0xc] sm:$0xf] %vm780_vm1, %v719_v41  ;;  %v623_v51 = vadd.f32 %v1215_v34, %v555_v45  ;;  %v639_v52 = vadd.f32 %v1215_v34, %v571_v46 }
  0xa5   :  { %800 = vst.msk [vmem:[%s1605_s4 + $0x4c] sm:$0xf] %vm780_vm1, %v735_v42  ;;  %v592_v53 = vadd.f32 %v1215_v34, %v524_v49  ;;  %v608_v54 = vadd.f32 %v1215_v34, %v540_v50 }
  0xa6   :  { %v687_v55 = vmax.f32 %v623_v51, 0.0  ;;  %v703_v56 = vmax.f32 %v639_v52, 0.0 }
  0xa7   :  { %v656_v57 = vmax.f32 %v592_v53, 0.0  ;;  %v672_v58 = vmax.f32 %v608_v54, 0.0 }
  0xa8   :  { %v751_v59 = vpack.c.bf16 %v687_v55, %v687_v55  ;;  %v767_v60 = vpack.c.bf16 %v703_v56, %v703_v56 }
  0xa9   :  { %v720_v61 = vpack.c.bf16 %v656_v57, %v656_v57  ;;  %v736_v62 = vpack.c.bf16 %v672_v58, %v672_v58  ;;  %v446_v63 = vpop.f32.mrf.mxu2  ;;  %v486_v0 = vpop.f32.mrf.mxu3 }
  0xaa   :  { %816 = vst.msk [vmem:[%s1605_s4 + $0x8c] sm:$0xf] %vm780_vm1, %v751_v59  ;;  %v556_v1 = vmul.f32 %v1210_v33, %v446_v63  ;;  %v572_v2 = vmul.f32 %v1210_v33, %v486_v0  ;;  %v368_v3 = vpop.f32.mrf.mxu0  ;;  %v408_v4 = vpop.f32.mrf.mxu1 }
  0xab   :  { %832 = vst.msk [vmem:[%s1605_s4 + $0xcc] sm:$0xf] %vm780_vm1, %v767_v60  ;;  %v525_v5 = vmul.f32 %v1210_v33, %v368_v3  ;;  %v541_v6 = vmul.f32 %v1210_v33, %v408_v4 }
  0xac   :  { %785 = vst.msk [vmem:[%s1605_s4 + $0x10] sm:$0xf] %vm780_vm1, %v720_v61  ;;  %v624_v7 = vadd.f32 %v1215_v34, %v556_v1  ;;  %v640_v8 = vadd.f32 %v1215_v34, %v572_v2 }
  0xad   :  { %801 = vst.msk [vmem:[%s1605_s4 + $0x50] sm:$0xf] %vm780_vm1, %v736_v62  ;;  %v593_v9 = vadd.f32 %v1215_v34, %v525_v5  ;;  %v609_v10 = vadd.f32 %v1215_v34, %v541_v6 }
  0xae   :  { %v688_v11 = vmax.f32 %v624_v7, 0.0  ;;  %v704_v12 = vmax.f32 %v640_v8, 0.0 }
  0xaf   :  { %v657_v13 = vmax.f32 %v593_v9, 0.0  ;;  %v673_v14 = vmax.f32 %v609_v10, 0.0 }
  0xb0   :  { %v752_v15 = vpack.c.bf16 %v688_v11, %v688_v11  ;;  %v768_v16 = vpack.c.bf16 %v704_v12, %v704_v12 }
  0xb1   :  { %v721_v17 = vpack.c.bf16 %v657_v13, %v657_v13  ;;  %v737_v18 = vpack.c.bf16 %v673_v14, %v673_v14  ;;  %v448_v19 = vpop.f32.mrf.mxu2  ;;  %v488_v20 = vpop.f32.mrf.mxu3 }
  0xb2   :  { %817 = vst.msk [vmem:[%s1605_s4 + $0x90] sm:$0xf] %vm780_vm1, %v752_v15  ;;  %v557_v21 = vmul.f32 %v1210_v33, %v448_v19  ;;  %v573_v22 = vmul.f32 %v1210_v33, %v488_v20  ;;  %v371_v23 = vpop.f32.mrf.mxu0  ;;  %v411_v24 = vpop.f32.mrf.mxu1 }
  0xb3   :  { %833 = vst.msk [vmem:[%s1605_s4 + $0xd0] sm:$0xf] %vm780_vm1, %v768_v16  ;;  %v526_v25 = vmul.f32 %v1210_v33, %v371_v23  ;;  %v542_v26 = vmul.f32 %v1210_v33, %v411_v24 }
  0xb4   :  { %786 = vst.msk [vmem:[%s1605_s4 + $0x14] sm:$0xf] %vm780_vm1, %v721_v17  ;;  %v625_v27 = vadd.f32 %v1215_v34, %v557_v21  ;;  %v641_v28 = vadd.f32 %v1215_v34, %v573_v22 }
  0xb5   :  { %802 = vst.msk [vmem:[%s1605_s4 + $0x54] sm:$0xf] %vm780_vm1, %v737_v18  ;;  %v594_v29 = vadd.f32 %v1215_v34, %v526_v25  ;;  %v610_v30 = vadd.f32 %v1215_v34, %v542_v26 }
  0xb6   :  { %v689_v31 = vmax.f32 %v625_v27, 0.0  ;;  %v705_v32 = vmax.f32 %v641_v28, 0.0 }
  0xb7   :  { %v658_v35 = vmax.f32 %v594_v29, 0.0  ;;  %v674_v36 = vmax.f32 %v610_v30, 0.0 }
  0xb8   :  { %v753_v37 = vpack.c.bf16 %v689_v31, %v689_v31  ;;  %v769_v38 = vpack.c.bf16 %v705_v32, %v705_v32 }
  0xb9   :  { %v722_v39 = vpack.c.bf16 %v658_v35, %v658_v35  ;;  %v738_v40 = vpack.c.bf16 %v674_v36, %v674_v36  ;;  %v451_v41 = vpop.f32.mrf.mxu2  ;;  %v491_v42 = vpop.f32.mrf.mxu3 }
  0xba   :  { %818 = vst.msk [vmem:[%s1605_s4 + $0x94] sm:$0xf] %vm780_vm1, %v753_v37  ;;  %v558_v43 = vmul.f32 %v1210_v33, %v451_v41  ;;  %v574_v44 = vmul.f32 %v1210_v33, %v491_v42  ;;  %v373_v45 = vpop.f32.mrf.mxu0  ;;  %v413_v46 = vpop.f32.mrf.mxu1 }
  0xbb   :  { %834 = vst.msk [vmem:[%s1605_s4 + $0xd4] sm:$0xf] %vm780_vm1, %v769_v38  ;;  %v527_v47 = vmul.f32 %v1210_v33, %v373_v45  ;;  %v543_v48 = vmul.f32 %v1210_v33, %v413_v46 }
  0xbc   :  { %787 = vst.msk [vmem:[%s1605_s4 + $0x18] sm:$0xf] %vm780_vm1, %v722_v39  ;;  %v626_v49 = vadd.f32 %v1215_v34, %v558_v43  ;;  %v642_v50 = vadd.f32 %v1215_v34, %v574_v44 }
  0xbd   :  { %803 = vst.msk [vmem:[%s1605_s4 + $0x58] sm:$0xf] %vm780_vm1, %v738_v40  ;;  %v595_v51 = vadd.f32 %v1215_v34, %v527_v47  ;;  %v611_v52 = vadd.f32 %v1215_v34, %v543_v48 }
  0xbe   :  { %v690_v53 = vmax.f32 %v626_v49, 0.0  ;;  %v706_v54 = vmax.f32 %v642_v50, 0.0 }
  0xbf   :  { %v659_v55 = vmax.f32 %v595_v51, 0.0  ;;  %v675_v56 = vmax.f32 %v611_v52, 0.0 }
  0xc0   :  { %v754_v57 = vpack.c.bf16 %v690_v53, %v690_v53  ;;  %v770_v58 = vpack.c.bf16 %v706_v54, %v706_v54 }
  0xc1   :  { %v723_v59 = vpack.c.bf16 %v659_v55, %v659_v55  ;;  %v739_v60 = vpack.c.bf16 %v675_v56, %v675_v56  ;;  %v453_v61 = vpop.f32.mrf.mxu2  ;;  %v493_v62 = vpop.f32.mrf.mxu3 }
  0xc2   :  { %819 = vst.msk [vmem:[%s1605_s4 + $0x98] sm:$0xf] %vm780_vm1, %v754_v57  ;;  %v559_v63 = vmul.f32 %v1210_v33, %v453_v61  ;;  %v575_v0 = vmul.f32 %v1210_v33, %v493_v62  ;;  %v376_v1 = vpop.f32.mrf.mxu0  ;;  %v416_v2 = vpop.f32.mrf.mxu1 }
  0xc3   :  { %835 = vst.msk [vmem:[%s1605_s4 + $0xd8] sm:$0xf] %vm780_vm1, %v770_v58  ;;  %v528_v3 = vmul.f32 %v1210_v33, %v376_v1  ;;  %v544_v4 = vmul.f32 %v1210_v33, %v416_v2 }
  0xc4   :  { %788 = vst.msk [vmem:[%s1605_s4 + $0x1c] sm:$0xf] %vm780_vm1, %v723_v59  ;;  %v627_v5 = vadd.f32 %v1215_v34, %v559_v63  ;;  %v643_v6 = vadd.f32 %v1215_v34, %v575_v0 }
  0xc5   :  { %804 = vst.msk [vmem:[%s1605_s4 + $0x5c] sm:$0xf] %vm780_vm1, %v739_v60  ;;  %v596_v7 = vadd.f32 %v1215_v34, %v528_v3  ;;  %v612_v8 = vadd.f32 %v1215_v34, %v544_v4 }
  0xc6   :  { %v691_v9 = vmax.f32 %v627_v5, 0.0  ;;  %v707_v10 = vmax.f32 %v643_v6, 0.0 }
  0xc7   :  { %v660_v11 = vmax.f32 %v596_v7, 0.0  ;;  %v676_v12 = vmax.f32 %v612_v8, 0.0 }
  0xc8   :  { %v755_v13 = vpack.c.bf16 %v691_v9, %v691_v9  ;;  %v771_v14 = vpack.c.bf16 %v707_v10, %v707_v10 }
  0xc9   :  { %v724_v15 = vpack.c.bf16 %v660_v11, %v660_v11  ;;  %v740_v16 = vpack.c.bf16 %v676_v12, %v676_v12  ;;  %v456_v17 = vpop.f32.mrf.mxu2  ;;  %v496_v18 = vpop.f32.mrf.mxu3 }
  0xca   :  { %820 = vst.msk [vmem:[%s1605_s4 + $0x9c] sm:$0xf] %vm780_vm1, %v755_v13  ;;  %v560_v19 = vmul.f32 %v1210_v33, %v456_v17  ;;  %v576_v20 = vmul.f32 %v1210_v33, %v496_v18  ;;  %v378_v21 = vpop.f32.mrf.mxu0  ;;  %v418_v22 = vpop.f32.mrf.mxu1 }
  0xcb   :  { %836 = vst.msk [vmem:[%s1605_s4 + $0xdc] sm:$0xf] %vm780_vm1, %v771_v14  ;;  %v529_v23 = vmul.f32 %v1210_v33, %v378_v21  ;;  %v545_v24 = vmul.f32 %v1210_v33, %v418_v22 }
  0xcc   :  { %789 = vst.msk [vmem:[%s1605_s4 + $0x20] sm:$0xf] %vm780_vm1, %v724_v15  ;;  %v628_v25 = vadd.f32 %v1215_v34, %v560_v19  ;;  %v644_v26 = vadd.f32 %v1215_v34, %v576_v20 }
  0xcd   :  { %805 = vst.msk [vmem:[%s1605_s4 + $0x60] sm:$0xf] %vm780_vm1, %v740_v16  ;;  %v597_v27 = vadd.f32 %v1215_v34, %v529_v23  ;;  %v613_v28 = vadd.f32 %v1215_v34, %v545_v24 }
  0xce   :  { %v692_v29 = vmax.f32 %v628_v25, 0.0  ;;  %v708_v30 = vmax.f32 %v644_v26, 0.0 }
  0xcf   :  { %v661_v31 = vmax.f32 %v597_v27, 0.0  ;;  %v677_v32 = vmax.f32 %v613_v28, 0.0 }
  0xd0   :  { %v756_v35 = vpack.c.bf16 %v692_v29, %v692_v29  ;;  %v772_v36 = vpack.c.bf16 %v708_v30, %v708_v30 }
  0xd1   :  { %v725_v37 = vpack.c.bf16 %v661_v31, %v661_v31  ;;  %v741_v38 = vpack.c.bf16 %v677_v32, %v677_v32  ;;  %v458_v39 = vpop.f32.mrf.mxu2  ;;  %v498_v40 = vpop.f32.mrf.mxu3 }
  0xd2   :  { %821 = vst.msk [vmem:[%s1605_s4 + $0xa0] sm:$0xf] %vm780_vm1, %v756_v35  ;;  %v561_v41 = vmul.f32 %v1210_v33, %v458_v39  ;;  %v577_v42 = vmul.f32 %v1210_v33, %v498_v40  ;;  %v381_v43 = vpop.f32.mrf.mxu0  ;;  %v421_v44 = vpop.f32.mrf.mxu1 }
  0xd3   :  { %837 = vst.msk [vmem:[%s1605_s4 + $0xe0] sm:$0xf] %vm780_vm1, %v772_v36  ;;  %v530_v45 = vmul.f32 %v1210_v33, %v381_v43  ;;  %v546_v46 = vmul.f32 %v1210_v33, %v421_v44 }
  0xd4   :  { %790 = vst.msk [vmem:[%s1605_s4 + $0x24] sm:$0xf] %vm780_vm1, %v725_v37  ;;  %v629_v47 = vadd.f32 %v1215_v34, %v561_v41  ;;  %v645_v48 = vadd.f32 %v1215_v34, %v577_v42 }
  0xd5   :  { %806 = vst.msk [vmem:[%s1605_s4 + $0x64] sm:$0xf] %vm780_vm1, %v741_v38  ;;  %v598_v49 = vadd.f32 %v1215_v34, %v530_v45  ;;  %v614_v50 = vadd.f32 %v1215_v34, %v546_v46 }
  0xd6   :  { %v693_v51 = vmax.f32 %v629_v47, 0.0  ;;  %v709_v52 = vmax.f32 %v645_v48, 0.0 }
  0xd7   :  { %v662_v53 = vmax.f32 %v598_v49, 0.0  ;;  %v678_v54 = vmax.f32 %v614_v50, 0.0 }
  0xd8   :  { %v757_v55 = vpack.c.bf16 %v693_v51, %v693_v51  ;;  %v773_v56 = vpack.c.bf16 %v709_v52, %v709_v52 }
  0xd9   :  { %v726_v57 = vpack.c.bf16 %v662_v53, %v662_v53  ;;  %v742_v58 = vpack.c.bf16 %v678_v54, %v678_v54  ;;  %v461_v59 = vpop.f32.mrf.mxu2  ;;  %v501_v60 = vpop.f32.mrf.mxu3 }
  0xda   :  { %822 = vst.msk [vmem:[%s1605_s4 + $0xa4] sm:$0xf] %vm780_vm1, %v757_v55  ;;  %v562_v61 = vmul.f32 %v1210_v33, %v461_v59  ;;  %v578_v62 = vmul.f32 %v1210_v33, %v501_v60  ;;  %v383_v63 = vpop.f32.mrf.mxu0  ;;  %v423_v0 = vpop.f32.mrf.mxu1 }
  0xdb   :  { %838 = vst.msk [vmem:[%s1605_s4 + $0xe4] sm:$0xf] %vm780_vm1, %v773_v56  ;;  %v531_v1 = vmul.f32 %v1210_v33, %v383_v63  ;;  %v547_v2 = vmul.f32 %v1210_v33, %v423_v0 }
  0xdc   :  { %791 = vst.msk [vmem:[%s1605_s4 + $0x28] sm:$0xf] %vm780_vm1, %v726_v57  ;;  %v630_v3 = vadd.f32 %v1215_v34, %v562_v61  ;;  %v646_v4 = vadd.f32 %v1215_v34, %v578_v62 }
  0xdd   :  { %807 = vst.msk [vmem:[%s1605_s4 + $0x68] sm:$0xf] %vm780_vm1, %v742_v58  ;;  %v599_v5 = vadd.f32 %v1215_v34, %v531_v1  ;;  %v615_v6 = vadd.f32 %v1215_v34, %v547_v2 }
  0xde   :  { %v694_v7 = vmax.f32 %v630_v3, 0.0  ;;  %v710_v8 = vmax.f32 %v646_v4, 0.0 }
  0xdf   :  { %v663_v9 = vmax.f32 %v599_v5, 0.0  ;;  %v679_v10 = vmax.f32 %v615_v6, 0.0 }
  0xe0   :  { %v758_v11 = vpack.c.bf16 %v694_v7, %v694_v7  ;;  %v774_v12 = vpack.c.bf16 %v710_v8, %v710_v8 }
  0xe1   :  { %v727_v13 = vpack.c.bf16 %v663_v9, %v663_v9  ;;  %v743_v14 = vpack.c.bf16 %v679_v10, %v679_v10  ;;  %v463_v15 = vpop.f32.mrf.mxu2  ;;  %v503_v16 = vpop.f32.mrf.mxu3 }
  0xe2   :  { %823 = vst.msk [vmem:[%s1605_s4 + $0xa8] sm:$0xf] %vm780_vm1, %v758_v11  ;;  %v563_v17 = vmul.f32 %v1210_v33, %v463_v15  ;;  %v579_v18 = vmul.f32 %v1210_v33, %v503_v16  ;;  %v386_v19 = vpop.f32.mrf.mxu0  ;;  %v426_v20 = vpop.f32.mrf.mxu1 }
  0xe3   :  { %839 = vst.msk [vmem:[%s1605_s4 + $0xe8] sm:$0xf] %vm780_vm1, %v774_v12  ;;  %v532_v21 = vmul.f32 %v1210_v33, %v386_v19  ;;  %v548_v22 = vmul.f32 %v1210_v33, %v426_v20 }
  0xe4   :  { %792 = vst.msk [vmem:[%s1605_s4 + $0x2c] sm:$0xf] %vm780_vm1, %v727_v13  ;;  %v631_v23 = vadd.f32 %v1215_v34, %v563_v17  ;;  %v647_v24 = vadd.f32 %v1215_v34, %v579_v18 }
  0xe5   :  { %808 = vst.msk [vmem:[%s1605_s4 + $0x6c] sm:$0xf] %vm780_vm1, %v743_v14  ;;  %v600_v25 = vadd.f32 %v1215_v34, %v532_v21  ;;  %v616_v26 = vadd.f32 %v1215_v34, %v548_v22 }
  0xe6   :  { %v695_v27 = vmax.f32 %v631_v23, 0.0  ;;  %v711_v28 = vmax.f32 %v647_v24, 0.0 }
  0xe7   :  { %v664_v29 = vmax.f32 %v600_v25, 0.0  ;;  %v680_v30 = vmax.f32 %v616_v26, 0.0 }
  0xe8   :  { %v759_v31 = vpack.c.bf16 %v695_v27, %v695_v27  ;;  %v775_v32 = vpack.c.bf16 %v711_v28, %v711_v28 }
  0xe9   :  { %v728_v35 = vpack.c.bf16 %v664_v29, %v664_v29  ;;  %v744_v36 = vpack.c.bf16 %v680_v30, %v680_v30  ;;  %v466_v37 = vpop.f32.mrf.mxu2  ;;  %v506_v38 = vpop.f32.mrf.mxu3 }
  0xea   :  { %824 = vst.msk [vmem:[%s1605_s4 + $0xac] sm:$0xf] %vm780_vm1, %v759_v31  ;;  %v564_v39 = vmul.f32 %v1210_v33, %v466_v37  ;;  %v580_v40 = vmul.f32 %v1210_v33, %v506_v38  ;;  %v388_v41 = vpop.f32.mrf.mxu0  ;;  %v428_v42 = vpop.f32.mrf.mxu1 }
  0xeb   :  { %840 = vst.msk [vmem:[%s1605_s4 + $0xec] sm:$0xf] %vm780_vm1, %v775_v32  ;;  %v533_v43 = vmul.f32 %v1210_v33, %v388_v41  ;;  %v549_v44 = vmul.f32 %v1210_v33, %v428_v42 }
  0xec   :  { %793 = vst.msk [vmem:[%s1605_s4 + $0x30] sm:$0xf] %vm780_vm1, %v728_v35  ;;  %v632_v45 = vadd.f32 %v1215_v34, %v564_v39  ;;  %v648_v46 = vadd.f32 %v1215_v34, %v580_v40 }
  0xed   :  { %809 = vst.msk [vmem:[%s1605_s4 + $0x70] sm:$0xf] %vm780_vm1, %v744_v36  ;;  %v601_v47 = vadd.f32 %v1215_v34, %v533_v43  ;;  %v617_v48 = vadd.f32 %v1215_v34, %v549_v44 }
  0xee   :  { %v696_v49 = vmax.f32 %v632_v45, 0.0  ;;  %v712_v50 = vmax.f32 %v648_v46, 0.0 }
  0xef   :  { %v665_v51 = vmax.f32 %v601_v47, 0.0  ;;  %v681_v52 = vmax.f32 %v617_v48, 0.0 }
  0xf0   :  { %v760_v53 = vpack.c.bf16 %v696_v49, %v696_v49  ;;  %v776_v54 = vpack.c.bf16 %v712_v50, %v712_v50 }
  0xf1   :  { %v729_v55 = vpack.c.bf16 %v665_v51, %v665_v51  ;;  %v745_v56 = vpack.c.bf16 %v681_v52, %v681_v52  ;;  %v468_v57 = vpop.f32.mrf.mxu2  ;;  %v508_v58 = vpop.f32.mrf.mxu3 }
  0xf2   :  { %825 = vst.msk [vmem:[%s1605_s4 + $0xb0] sm:$0xf] %vm780_vm1, %v760_v53  ;;  %v565_v59 = vmul.f32 %v1210_v33, %v468_v57  ;;  %v581_v60 = vmul.f32 %v1210_v33, %v508_v58  ;;  %v391_v61 = vpop.f32.mrf.mxu0  ;;  %v431_v62 = vpop.f32.mrf.mxu1 }
  0xf3   :  { %841 = vst.msk [vmem:[%s1605_s4 + $0xf0] sm:$0xf] %vm780_vm1, %v776_v54  ;;  %v534_v63 = vmul.f32 %v1210_v33, %v391_v61  ;;  %v550_v0 = vmul.f32 %v1210_v33, %v431_v62 }
  0xf4   :  { %794 = vst.msk [vmem:[%s1605_s4 + $0x34] sm:$0xf] %vm780_vm1, %v729_v55  ;;  %v633_v1 = vadd.f32 %v1215_v34, %v565_v59  ;;  %v649_v2 = vadd.f32 %v1215_v34, %v581_v60 }
  0xf5   :  { %810 = vst.msk [vmem:[%s1605_s4 + $0x74] sm:$0xf] %vm780_vm1, %v745_v56  ;;  %v602_v3 = vadd.f32 %v1215_v34, %v534_v63  ;;  %v618_v4 = vadd.f32 %v1215_v34, %v550_v0 }
  0xf6   :  { %v697_v5 = vmax.f32 %v633_v1, 0.0  ;;  %v713_v6 = vmax.f32 %v649_v2, 0.0 }
  0xf7   :  { %v666_v7 = vmax.f32 %v602_v3, 0.0  ;;  %v682_v8 = vmax.f32 %v618_v4, 0.0 }
  0xf8   :  { %v761_v9 = vpack.c.bf16 %v697_v5, %v697_v5  ;;  %v777_v10 = vpack.c.bf16 %v713_v6, %v713_v6 }
  0xf9   :  { %v730_v11 = vpack.c.bf16 %v666_v7, %v666_v7  ;;  %v746_v12 = vpack.c.bf16 %v682_v8, %v682_v8  ;;  %v471_v13 = vpop.f32.mrf.mxu2  ;;  %v511_v14 = vpop.f32.mrf.mxu3 }
  0xfa   :  { %826 = vst.msk [vmem:[%s1605_s4 + $0xb4] sm:$0xf] %vm780_vm1, %v761_v9  ;;  %v566_v15 = vmul.f32 %v1210_v33, %v471_v13  ;;  %v582_v16 = vmul.f32 %v1210_v33, %v511_v14  ;;  %v393_v17 = vpop.f32.mrf.mxu0  ;;  %v433_v18 = vpop.f32.mrf.mxu1 }
  0xfb   :  { %842 = vst.msk [vmem:[%s1605_s4 + $0xf4] sm:$0xf] %vm780_vm1, %v777_v10  ;;  %v535_v19 = vmul.f32 %v1210_v33, %v393_v17  ;;  %v551_v20 = vmul.f32 %v1210_v33, %v433_v18 }
  0xfc   :  { %795 = vst.msk [vmem:[%s1605_s4 + $0x38] sm:$0xf] %vm780_vm1, %v730_v11  ;;  %v634_v21 = vadd.f32 %v1215_v34, %v566_v15  ;;  %v650_v22 = vadd.f32 %v1215_v34, %v582_v16 }
  0xfd   :  { %811 = vst.msk [vmem:[%s1605_s4 + $0x78] sm:$0xf] %vm780_vm1, %v746_v12  ;;  %v603_v23 = vadd.f32 %v1215_v34, %v535_v19  ;;  %v619_v24 = vadd.f32 %v1215_v34, %v551_v20 }
  0xfe   :  { %v698_v25 = vmax.f32 %v634_v21, 0.0  ;;  %v714_v26 = vmax.f32 %v650_v22, 0.0 }
  0xff   :  { %v667_v27 = vmax.f32 %v603_v23, 0.0  ;;  %v683_v28 = vmax.f32 %v619_v24, 0.0 }
 0x100   :  { %v762_v29 = vpack.c.bf16 %v698_v25, %v698_v25  ;;  %v778_v30 = vpack.c.bf16 %v714_v26, %v714_v26 }
 0x101   :  { %v731_v31 = vpack.c.bf16 %v667_v27, %v667_v27  ;;  %v747_v32 = vpack.c.bf16 %v683_v28, %v683_v28  ;;  %v473_v35 = vpop.f32.mrf.mxu2  ;;  %v513_v36 = vpop.f32.mrf.mxu3 }
 0x102   :  { %827 = vst.msk [vmem:[%s1605_s4 + $0xb8] sm:$0xf] %vm780_vm1, %v762_v29  ;;  %v567_v37 = vmul.f32 %v1210_v33, %v473_v35  ;;  %v583_v38 = vmul.f32 %v1210_v33, %v513_v36 }
 0x103   :  { %843 = vst.msk [vmem:[%s1605_s4 + $0xf8] sm:$0xf] %vm780_vm1, %v778_v30 }
 0x104   :  { %796 = vst.msk [vmem:[%s1605_s4 + $0x3c] sm:$0xf] %vm780_vm1, %v731_v31  ;;  %v635_v39 = vadd.f32 %v1215_v34, %v567_v37  ;;  %v651_v40 = vadd.f32 %v1215_v34, %v583_v38 }
 0x105   :  { %812 = vst.msk [vmem:[%s1605_s4 + $0x7c] sm:$0xf] %vm780_vm1, %v747_v32 }
 0x106   :  { %v699_v33 = vmax.f32 %v635_v39, 0.0  ;;  %v715_v41 = vmax.f32 %v651_v40, 0.0 }
 0x108   :  { %v763_v42 = vpack.c.bf16 %v699_v33, %v699_v33  ;;  %v779_v43 = vpack.c.bf16 %v715_v41, %v715_v41 }
 0x10a   :  { %828 = vst.msk [vmem:[%s1605_s4 + $0xbc] sm:$0xf] %vm780_vm1, %v763_v42 }
 0x10b   :  { %844 = vst.msk [vmem:[%s1605_s4 + $0xfc] sm:$0xf] %vm780_vm1, %v779_v43 }

</bundles_post_ra>
